<compile_context>
chip_gen: v7x
topology: tpu7x:2x2x1
jax: 0.10.0
libtpu: 0.0.40
codegen_flags: <defaults>
</compile_context>

<pallas_src>
import functools

import jax
import jax.numpy as jnp
from jax.experimental import pallas as pl
from jax.experimental.pallas import tpu as pltpu


# ----------------------------- helpers --------------------------------------


def _round_up(x: int, m: int) -> int:
    return -(-x // m) * m


def _sublane(dtype_bytes: int) -> int:
    # Native sublane tile per dtype width (f32: 8, bf16: 16, int8/fp8: 32).
    return 8 if dtype_bytes >= 4 else (16 if dtype_bytes == 2 else 32)


def _vmem_capacity_bytes() -> int:
    """Physical VMEM per TensorCore; conservative fallback = v7x (64 MiB)."""
    try:
        info = pltpu.get_tpu_info()
        cap = getattr(info, "vmem_capacity_bytes", None)
        if cap:
            return int(cap)
    except Exception:
        pass
    return 64 * 1024 * 1024


def _choose_t_block(T: int, C: int, F: int, K: int, dtype_bytes: int,
                    vmem_capacity: int) -> int:
    """Largest Tb (multiple of the dtype sublane tile) whose *padded*,
    double-buffered in+out working set fits the per-generation budget."""
    sub = _sublane(dtype_bytes)
    f_pad = _round_up(max(F, 1), 128)          # lane padding (257 -> 384)
    # Double-buffered (Buffered(2)) input + output slabs, in padded bytes.
    bytes_per_t_row = 2 * (1 + K) * C * f_pad * dtype_bytes
    # ~45% of physical VMEM, capped at 40 MiB: reaches the tiled-copy HBM
    # roofline on v5e/v6e (128 MiB) and stays safe on v7x (64 MiB/TC).
    budget = min(int(0.45 * vmem_capacity), 40 * 1024 * 1024)
    tb = budget // max(bytes_per_t_row, 1)
    if tb >= T:
        return T                               # full extent is always legal
    return max(sub, (tb // sub) * sub)


# ----------------------------- kernel ---------------------------------------


def _sfe_kernel(x_ref, o_ref, *, K: int, C: int):
    # x_ref: (1, C, Tb, F)   o_ref: (1, C*K, Tb, F)
    pad = (K - 1) // 2
    _, _, Tb, F = x_ref.shape
    dtype = x_ref.dtype
    # Hoisted edge-zero constants: one splat per edge width instead of
    # 2*(K-1)*C (JAX does not CSE broadcast_in_dim).
    zeros_by_width = {w: jnp.zeros((Tb, w), dtype) for w in range(1, pad + 1)}

    for c in range(C):                         # static, small
        for j in range(K):                     # static, small (K = 3)
            shift = j - pad                    # out[:, f] = x[:, f + shift] (or 0)
            oc = c * K + j
            # Re-load per tap: bounds the source live range so the
            # (tile + rolled tile) pair never outgrows the vreg file.
            x = x_ref[0, c]                    # (Tb, F)
            if shift == 0:
                # Centre tap: plain unmasked copy.
                o_ref[0, oc] = x
            else:
                # Lane rotate on the XLU (off the vld/vst critical slots),
                # then zero only the |shift| invalid edge lane columns.
                rolled = pltpu.roll(x, shift=(-shift) % F, axis=1)
                o_ref[0, oc] = rolled
                w = abs(shift)
                if shift > 0:
                    o_ref[0, oc, :, F - w:] = zeros_by_width[w]
                else:
                    o_ref[0, oc, :, :w] = zeros_by_width[w]


# ----------------------------- wrapper --------------------------------------


def sfe(x, kernel_size: int = 3, stride: int = 1, t_block: int | None = None):
    """Pallas implementation of SFE.forward (stride == 1, odd kernel_size)."""
    assert stride == 1, "SFE kernel implemented for stride=1 (module default)"
    assert kernel_size % 2 == 1, "SFE kernel requires odd kernel_size"
    B, C, T, F = x.shape
    K = kernel_size
    dtype_bytes = jnp.dtype(x.dtype).itemsize
    sub = _sublane(dtype_bytes)
    vmem_cap = _vmem_capacity_bytes()

    # --- pick the T block ----------------------------------------------------
    if t_block is None:
        tb = _choose_t_block(T, C, F, K, dtype_bytes, vmem_cap)
    else:
        # Validate caller override: must be T or a sublane-tile multiple.
        tb = min(int(t_block), T)
        if tb < T:
            tb = min(_round_up(max(tb, 1), sub), T)

    # Keep at least ~4 grid steps (best effort) so the double-buffered
    # pipeline overlaps and both v7x TensorCores are fed.
    MIN_STEPS = 4
    want_t_blocks = -(-MIN_STEPS // B)         # ceil(MIN_STEPS / B)
    if want_t_blocks > 1 and pl.cdiv(T, tb) < want_t_blocks:
        cap = max(sub, ((-(-T // want_t_blocks)) // sub) * sub)
        if cap < tb:
            tb = cap

    # --- explicit scoped-VMEM limit: padded working set + headroom -----------
    tb_pad = _round_up(tb, sub)
    f_pad = _round_up(F, 128)
    working_set = 2 * (1 + K) * C * tb_pad * f_pad * dtype_bytes
    vmem_limit = min(max(int(working_set * 1.25) + (2 << 20), 16 << 20), vmem_cap)

    kernel = functools.partial(_sfe_kernel, K=K, C=C)
    return pl.pallas_call(
        kernel,
        out_shape=jax.ShapeDtypeStruct((B, C * K, T, F), x.dtype),
        grid=(B, pl.cdiv(T, tb)),
        in_specs=[pl.BlockSpec((1, C, tb, F), lambda b, t: (b, 0, t, 0))],
        out_specs=pl.BlockSpec((1, C * K, tb, F), lambda b, t: (b, 0, t, 0)),
        compiler_params=pltpu.CompilerParams(
            dimension_semantics=("parallel", "parallel"),
            vmem_limit_bytes=vmem_limit),
        cost_estimate=pl.CostEstimate(
            flops=0,
            transcendentals=0,
            bytes_accessed=(1 + K) * B * C * T * F * dtype_bytes),
    )(x)


def sfe_reference(x, kernel_size: int = 3):
    """Pure-JAX reference matching nn.Unfold((1,K), pad=(0,(K-1)//2)) + reshape."""
    B, C, T, F = x.shape
    K = kernel_size
    pad = (K - 1) // 2
    xp = jnp.pad(x, ((0, 0), (0, 0), (0, 0), (pad, pad)))
    cols = [xp[:, :, :, j:j + F] for j in range(K)]          # each (B,C,T,F)
    out = jnp.stack(cols, axis=2)                            # (B,C,K,T,F)
    return out.reshape(B, C * K, T, F)


if __name__ == "__main__":
    key = jax.random.PRNGKey(0)
    B, C, T, F = 2, 4, 16, 16
    x = jax.random.normal(key, (B, C, T, F), dtype=jnp.float32)

    out = sfe(x, kernel_size=3, stride=1)
    out = jax.block_until_ready(out)

    ref = sfe_reference(x, kernel_size=3)
    assert out.shape == (B, C * 3, T, F), out.shape
    assert jnp.allclose(out, ref, atol=1e-6), "mismatch vs reference"

    print("KERNEL_OK")
</pallas_src>

<mosaic_0001>
module attributes {stable_mosaic.version = 11 : i64} {
  func.func @_sfe_kernel(%arg0: i32, %arg1: i32, %arg2: memref<1x4x8x16xf32, #tpu.memory_space<vmem>>, %arg3: memref<1x12x8x16xf32, #tpu.memory_space<vmem>>) attributes {dimension_semantics = [#tpu.dimension_semantics<parallel>, #tpu.dimension_semantics<parallel>], iteration_bounds = array<i64: 2, 2>, scalar_prefetch = 0 : i64, scratch_operands = 0 : i64, tpu.core_type = #tpu.core_type<tc>, window_params = [{transform_indices = @transform_0, window_bounds = array<i64: 1, 4, 8, 16>}, {transform_indices = @transform_1, window_bounds = array<i64: 1, 12, 8, 16>}]} {
    %cst = arith.constant 0.000000e+00 : f32
    %0 = vector.broadcast %cst : f32 to vector<8x1xf32>
    %c0 = arith.constant 0 : index
    %c0_0 = arith.constant 0 : index
    %c0_1 = arith.constant 0 : index
    %c0_2 = arith.constant 0 : index
    %1 = vector.load %arg2[%c0, %c0_0, %c0_1, %c0_2] : memref<1x4x8x16xf32, #tpu.memory_space<vmem>>, vector<1x1x8x16xf32>
    %2 = vector.shape_cast %1 : vector<1x1x8x16xf32> to vector<8x16xf32>
    %c1_i32 = arith.constant 1 : i32
    %3 = tpu.dynamic_rotate %2 by %c1_i32 dim 1 : vector<8x16xf32>, i32 -> vector<8x16xf32>
    %c0_3 = arith.constant 0 : index
    %c0_4 = arith.constant 0 : index
    %c0_5 = arith.constant 0 : index
    %c0_6 = arith.constant 0 : index
    %4 = vector.load %arg3[%c0_3, %c0_4, %c0_5, %c0_6] : memref<1x12x8x16xf32, #tpu.memory_space<vmem>>, vector<1x1x8x16xf32>
    %5 = vector.shape_cast %4 : vector<1x1x8x16xf32> to vector<8x16xf32>
    %6 = vector.shape_cast %3 : vector<8x16xf32> to vector<1x1x8x16xf32>
    tpu.vector_store %arg3[%c0_3, %c0_4, %c0_5, %c0_6], %6 {strides = array<i32>} : memref<1x12x8x16xf32, #tpu.memory_space<vmem>>, vector<1x1x8x16xf32>,
    %c0_7 = arith.constant 0 : index
    %c0_8 = arith.constant 0 : index
    %c0_9 = arith.constant 0 : index
    %c0_10 = arith.constant 0 : index
    %7 = vector.load %arg3[%c0_7, %c0_8, %c0_9, %c0_10] : memref<1x12x8x16xf32, #tpu.memory_space<vmem>>, vector<1x1x8x1xf32>
    %8 = vector.shape_cast %7 : vector<1x1x8x1xf32> to vector<8x1xf32>
    %9 = vector.shape_cast %0 : vector<8x1xf32> to vector<1x1x8x1xf32>
    tpu.vector_store %arg3[%c0_7, %c0_8, %c0_9, %c0_10], %9 {strides = array<i32>} : memref<1x12x8x16xf32, #tpu.memory_space<vmem>>, vector<1x1x8x1xf32>,
    %c0_11 = arith.constant 0 : index
    %c0_12 = arith.constant 0 : index
    %c0_13 = arith.constant 0 : index
    %c0_14 = arith.constant 0 : index
    %10 = vector.load %arg2[%c0_11, %c0_12, %c0_13, %c0_14] : memref<1x4x8x16xf32, #tpu.memory_space<vmem>>, vector<1x1x8x16xf32>
    %11 = vector.shape_cast %10 : vector<1x1x8x16xf32> to vector<8x16xf32>
    %c0_15 = arith.constant 0 : index
    %c1 = arith.constant 1 : index
    %c0_16 = arith.constant 0 : index
    %c0_17 = arith.constant 0 : index
    %12 = vector.load %arg3[%c0_15, %c1, %c0_16, %c0_17] : memref<1x12x8x16xf32, #tpu.memory_space<vmem>>, vector<1x1x8x16xf32>
    %13 = vector.shape_cast %12 : vector<1x1x8x16xf32> to vector<8x16xf32>
    %14 = vector.shape_cast %11 : vector<8x16xf32> to vector<1x1x8x16xf32>
    tpu.vector_store %arg3[%c0_15, %c1, %c0_16, %c0_17], %14 {strides = array<i32>} : memref<1x12x8x16xf32, #tpu.memory_space<vmem>>, vector<1x1x8x16xf32>,
    %c0_18 = arith.constant 0 : index
    %c0_19 = arith.constant 0 : index
    %c0_20 = arith.constant 0 : index
    %c0_21 = arith.constant 0 : index
    %15 = vector.load %arg2[%c0_18, %c0_19, %c0_20, %c0_21] : memref<1x4x8x16xf32, #tpu.memory_space<vmem>>, vector<1x1x8x16xf32>
    %16 = vector.shape_cast %15 : vector<1x1x8x16xf32> to vector<8x16xf32>
    %c15_i32 = arith.constant 15 : i32
    %17 = tpu.dynamic_rotate %16 by %c15_i32 dim 1 : vector<8x16xf32>, i32 -> vector<8x16xf32>
    %c0_22 = arith.constant 0 : index
    %c2 = arith.constant 2 : index
    %c0_23 = arith.constant 0 : index
    %c0_24 = arith.constant 0 : index
    %18 = vector.load %arg3[%c0_22, %c2, %c0_23, %c0_24] : memref<1x12x8x16xf32, #tpu.memory_space<vmem>>, vector<1x1x8x16xf32>
    %19 = vector.shape_cast %18 : vector<1x1x8x16xf32> to vector<8x16xf32>
    %20 = vector.shape_cast %17 : vector<8x16xf32> to vector<1x1x8x16xf32>
    tpu.vector_store %arg3[%c0_22, %c2, %c0_23, %c0_24], %20 {strides = array<i32>} : memref<1x12x8x16xf32, #tpu.memory_space<vmem>>, vector<1x1x8x16xf32>,
    %c0_25 = arith.constant 0 : index
    %c2_26 = arith.constant 2 : index
    %c0_27 = arith.constant 0 : index
    %c15 = arith.constant 15 : index
    %21 = vector.load %arg3[%c0_25, %c2_26, %c0_27, %c15] : memref<1x12x8x16xf32, #tpu.memory_space<vmem>>, vector<1x1x8x1xf32>
    %22 = vector.shape_cast %21 : vector<1x1x8x1xf32> to vector<8x1xf32>
    %23 = vector.shape_cast %0 : vector<8x1xf32> to vector<1x1x8x1xf32>
    tpu.vector_store %arg3[%c0_25, %c2_26, %c0_27, %c15], %23 {strides = array<i32>} : memref<1x12x8x16xf32, #tpu.memory_space<vmem>>, vector<1x1x8x1xf32>,
    %c0_28 = arith.constant 0 : index
    %c1_29 = arith.constant 1 : index
    %c0_30 = arith.constant 0 : index
    %c0_31 = arith.constant 0 : index
    %24 = vector.load %arg2[%c0_28, %c1_29, %c0_30, %c0_31] : memref<1x4x8x16xf32, #tpu.memory_space<vmem>>, vector<1x1x8x16xf32>
    %25 = vector.shape_cast %24 : vector<1x1x8x16xf32> to vector<8x16xf32>
    %c1_i32_32 = arith.constant 1 : i32
    %26 = tpu.dynamic_rotate %25 by %c1_i32_32 dim 1 : vector<8x16xf32>, i32 -> vector<8x16xf32>
    %c0_33 = arith.constant 0 : index
    %c3 = arith.constant 3 : index
    %c0_34 = arith.constant 0 : index
    %c0_35 = arith.constant 0 : index
    %27 = vector.load %arg3[%c0_33, %c3, %c0_34, %c0_35] : memref<1x12x8x16xf32, #tpu.memory_space<vmem>>, vector<1x1x8x16xf32>
    %28 = vector.shape_cast %27 : vector<1x1x8x16xf32> to vector<8x16xf32>
    %29 = vector.shape_cast %26 : vector<8x16xf32> to vector<1x1x8x16xf32>
    tpu.vector_store %arg3[%c0_33, %c3, %c0_34, %c0_35], %29 {strides = array<i32>} : memref<1x12x8x16xf32, #tpu.memory_space<vmem>>, vector<1x1x8x16xf32>,
    %c0_36 = arith.constant 0 : index
    %c3_37 = arith.constant 3 : index
    %c0_38 = arith.constant 0 : index
    %c0_39 = arith.constant 0 : index
    %30 = vector.load %arg3[%c0_36, %c3_37, %c0_38, %c0_39] : memref<1x12x8x16xf32, #tpu.memory_space<vmem>>, vector<1x1x8x1xf32>
    %31 = vector.shape_cast %30 : vector<1x1x8x1xf32> to vector<8x1xf32>
    %32 = vector.shape_cast %0 : vector<8x1xf32> to vector<1x1x8x1xf32>
    tpu.vector_store %arg3[%c0_36, %c3_37, %c0_38, %c0_39], %32 {strides = array<i32>} : memref<1x12x8x16xf32, #tpu.memory_space<vmem>>, vector<1x1x8x1xf32>,
    %c0_40 = arith.constant 0 : index
    %c1_41 = arith.constant 1 : index
    %c0_42 = arith.constant 0 : index
    %c0_43 = arith.constant 0 : index
    %33 = vector.load %arg2[%c0_40, %c1_41, %c0_42, %c0_43] : memref<1x4x8x16xf32, #tpu.memory_space<vmem>>, vector<1x1x8x16xf32>
    %34 = vector.shape_cast %33 : vector<1x1x8x16xf32> to vector<8x16xf32>
    %c0_44 = arith.constant 0 : index
    %c4 = arith.constant 4 : index
    %c0_45 = arith.constant 0 : index
    %c0_46 = arith.constant 0 : index
    %35 = vector.load %arg3[%c0_44, %c4, %c0_45, %c0_46] : memref<1x12x8x16xf32, #tpu.memory_space<vmem>>, vector<1x1x8x16xf32>
    %36 = vector.shape_cast %35 : vector<1x1x8x16xf32> to vector<8x16xf32>
    %37 = vector.shape_cast %34 : vector<8x16xf32> to vector<1x1x8x16xf32>
    tpu.vector_store %arg3[%c0_44, %c4, %c0_45, %c0_46], %37 {strides = array<i32>} : memref<1x12x8x16xf32, #tpu.memory_space<vmem>>, vector<1x1x8x16xf32>,
    %c0_47 = arith.constant 0 : index
    %c1_48 = arith.constant 1 : index
    %c0_49 = arith.constant 0 : index
    %c0_50 = arith.constant 0 : index
    %38 = vector.load %arg2[%c0_47, %c1_48, %c0_49, %c0_50] : memref<1x4x8x16xf32, #tpu.memory_space<vmem>>, vector<1x1x8x16xf32>
    %39 = vector.shape_cast %38 : vector<1x1x8x16xf32> to vector<8x16xf32>
    %c15_i32_51 = arith.constant 15 : i32
    %40 = tpu.dynamic_rotate %39 by %c15_i32_51 dim 1 : vector<8x16xf32>, i32 -> vector<8x16xf32>
    %c0_52 = arith.constant 0 : index
    %c5 = arith.constant 5 : index
    %c0_53 = arith.constant 0 : index
    %c0_54 = arith.constant 0 : index
    %41 = vector.load %arg3[%c0_52, %c5, %c0_53, %c0_54] : memref<1x12x8x16xf32, #tpu.memory_space<vmem>>, vector<1x1x8x16xf32>
    %42 = vector.shape_cast %41 : vector<1x1x8x16xf32> to vector<8x16xf32>
    %43 = vector.shape_cast %40 : vector<8x16xf32> to vector<1x1x8x16xf32>
    tpu.vector_store %arg3[%c0_52, %c5, %c0_53, %c0_54], %43 {strides = array<i32>} : memref<1x12x8x16xf32, #tpu.memory_space<vmem>>, vector<1x1x8x16xf32>,
    %c0_55 = arith.constant 0 : index
    %c5_56 = arith.constant 5 : index
    %c0_57 = arith.constant 0 : index
    %c15_58 = arith.constant 15 : index
    %44 = vector.load %arg3[%c0_55, %c5_56, %c0_57, %c15_58] : memref<1x12x8x16xf32, #tpu.memory_space<vmem>>, vector<1x1x8x1xf32>
    %45 = vector.shape_cast %44 : vector<1x1x8x1xf32> to vector<8x1xf32>
    %46 = vector.shape_cast %0 : vector<8x1xf32> to vector<1x1x8x1xf32>
    tpu.vector_store %arg3[%c0_55, %c5_56, %c0_57, %c15_58], %46 {strides = array<i32>} : memref<1x12x8x16xf32, #tpu.memory_space<vmem>>, vector<1x1x8x1xf32>,
    %c0_59 = arith.constant 0 : index
    %c2_60 = arith.constant 2 : index
    %c0_61 = arith.constant 0 : index
    %c0_62 = arith.constant 0 : index
    %47 = vector.load %arg2[%c0_59, %c2_60, %c0_61, %c0_62] : memref<1x4x8x16xf32, #tpu.memory_space<vmem>>, vector<1x1x8x16xf32>
    %48 = vector.shape_cast %47 : vector<1x1x8x16xf32> to vector<8x16xf32>
    %c1_i32_63 = arith.constant 1 : i32
    %49 = tpu.dynamic_rotate %48 by %c1_i32_63 dim 1 : vector<8x16xf32>, i32 -> vector<8x16xf32>
    %c0_64 = arith.constant 0 : index
    %c6 = arith.constant 6 : index
    %c0_65 = arith.constant 0 : index
    %c0_66 = arith.constant 0 : index
    %50 = vector.load %arg3[%c0_64, %c6, %c0_65, %c0_66] : memref<1x12x8x16xf32, #tpu.memory_space<vmem>>, vector<1x1x8x16xf32>
    %51 = vector.shape_cast %50 : vector<1x1x8x16xf32> to vector<8x16xf32>
    %52 = vector.shape_cast %49 : vector<8x16xf32> to vector<1x1x8x16xf32>
    tpu.vector_store %arg3[%c0_64, %c6, %c0_65, %c0_66], %52 {strides = array<i32>} : memref<1x12x8x16xf32, #tpu.memory_space<vmem>>, vector<1x1x8x16xf32>,
    %c0_67 = arith.constant 0 : index
    %c6_68 = arith.constant 6 : index
    %c0_69 = arith.constant 0 : index
    %c0_70 = arith.constant 0 : index
    %53 = vector.load %arg3[%c0_67, %c6_68, %c0_69, %c0_70] : memref<1x12x8x16xf32, #tpu.memory_space<vmem>>, vector<1x1x8x1xf32>
    %54 = vector.shape_cast %53 : vector<1x1x8x1xf32> to vector<8x1xf32>
    %55 = vector.shape_cast %0 : vector<8x1xf32> to vector<1x1x8x1xf32>
    tpu.vector_store %arg3[%c0_67, %c6_68, %c0_69, %c0_70], %55 {strides = array<i32>} : memref<1x12x8x16xf32, #tpu.memory_space<vmem>>, vector<1x1x8x1xf32>,
    %c0_71 = arith.constant 0 : index
    %c2_72 = arith.constant 2 : index
    %c0_73 = arith.constant 0 : index
    %c0_74 = arith.constant 0 : index
    %56 = vector.load %arg2[%c0_71, %c2_72, %c0_73, %c0_74] : memref<1x4x8x16xf32, #tpu.memory_space<vmem>>, vector<1x1x8x16xf32>
    %57 = vector.shape_cast %56 : vector<1x1x8x16xf32> to vector<8x16xf32>
    %c0_75 = arith.constant 0 : index
    %c7 = arith.constant 7 : index
    %c0_76 = arith.constant 0 : index
    %c0_77 = arith.constant 0 : index
    %58 = vector.load %arg3[%c0_75, %c7, %c0_76, %c0_77] : memref<1x12x8x16xf32, #tpu.memory_space<vmem>>, vector<1x1x8x16xf32>
    %59 = vector.shape_cast %58 : vector<1x1x8x16xf32> to vector<8x16xf32>
    %60 = vector.shape_cast %57 : vector<8x16xf32> to vector<1x1x8x16xf32>
    tpu.vector_store %arg3[%c0_75, %c7, %c0_76, %c0_77], %60 {strides = array<i32>} : memref<1x12x8x16xf32, #tpu.memory_space<vmem>>, vector<1x1x8x16xf32>,
    %c0_78 = arith.constant 0 : index
    %c2_79 = arith.constant 2 : index
    %c0_80 = arith.constant 0 : index
    %c0_81 = arith.constant 0 : index
    %61 = vector.load %arg2[%c0_78, %c2_79, %c0_80, %c0_81] : memref<1x4x8x16xf32, #tpu.memory_space<vmem>>, vector<1x1x8x16xf32>
    %62 = vector.shape_cast %61 : vector<1x1x8x16xf32> to vector<8x16xf32>
    %c15_i32_82 = arith.constant 15 : i32
    %63 = tpu.dynamic_rotate %62 by %c15_i32_82 dim 1 : vector<8x16xf32>, i32 -> vector<8x16xf32>
    %c0_83 = arith.constant 0 : index
    %c8 = arith.constant 8 : index
    %c0_84 = arith.constant 0 : index
    %c0_85 = arith.constant 0 : index
    %64 = vector.load %arg3[%c0_83, %c8, %c0_84, %c0_85] : memref<1x12x8x16xf32, #tpu.memory_space<vmem>>, vector<1x1x8x16xf32>
    %65 = vector.shape_cast %64 : vector<1x1x8x16xf32> to vector<8x16xf32>
    %66 = vector.shape_cast %63 : vector<8x16xf32> to vector<1x1x8x16xf32>
    tpu.vector_store %arg3[%c0_83, %c8, %c0_84, %c0_85], %66 {strides = array<i32>} : memref<1x12x8x16xf32, #tpu.memory_space<vmem>>, vector<1x1x8x16xf32>,
    %c0_86 = arith.constant 0 : index
    %c8_87 = arith.constant 8 : index
    %c0_88 = arith.constant 0 : index
    %c15_89 = arith.constant 15 : index
    %67 = vector.load %arg3[%c0_86, %c8_87, %c0_88, %c15_89] : memref<1x12x8x16xf32, #tpu.memory_space<vmem>>, vector<1x1x8x1xf32>
    %68 = vector.shape_cast %67 : vector<1x1x8x1xf32> to vector<8x1xf32>
    %69 = vector.shape_cast %0 : vector<8x1xf32> to vector<1x1x8x1xf32>
    tpu.vector_store %arg3[%c0_86, %c8_87, %c0_88, %c15_89], %69 {strides = array<i32>} : memref<1x12x8x16xf32, #tpu.memory_space<vmem>>, vector<1x1x8x1xf32>,
    %c0_90 = arith.constant 0 : index
    %c3_91 = arith.constant 3 : index
    %c0_92 = arith.constant 0 : index
    %c0_93 = arith.constant 0 : index
    %70 = vector.load %arg2[%c0_90, %c3_91, %c0_92, %c0_93] : memref<1x4x8x16xf32, #tpu.memory_space<vmem>>, vector<1x1x8x16xf32>
    %71 = vector.shape_cast %70 : vector<1x1x8x16xf32> to vector<8x16xf32>
    %c1_i32_94 = arith.constant 1 : i32
    %72 = tpu.dynamic_rotate %71 by %c1_i32_94 dim 1 : vector<8x16xf32>, i32 -> vector<8x16xf32>
    %c0_95 = arith.constant 0 : index
    %c9 = arith.constant 9 : index
    %c0_96 = arith.constant 0 : index
    %c0_97 = arith.constant 0 : index
    %73 = vector.load %arg3[%c0_95, %c9, %c0_96, %c0_97] : memref<1x12x8x16xf32, #tpu.memory_space<vmem>>, vector<1x1x8x16xf32>
    %74 = vector.shape_cast %73 : vector<1x1x8x16xf32> to vector<8x16xf32>
    %75 = vector.shape_cast %72 : vector<8x16xf32> to vector<1x1x8x16xf32>
    tpu.vector_store %arg3[%c0_95, %c9, %c0_96, %c0_97], %75 {strides = array<i32>} : memref<1x12x8x16xf32, #tpu.memory_space<vmem>>, vector<1x1x8x16xf32>,
    %c0_98 = arith.constant 0 : index
    %c9_99 = arith.constant 9 : index
    %c0_100 = arith.constant 0 : index
    %c0_101 = arith.constant 0 : index
    %76 = vector.load %arg3[%c0_98, %c9_99, %c0_100, %c0_101] : memref<1x12x8x16xf32, #tpu.memory_space<vmem>>, vector<1x1x8x1xf32>
    %77 = vector.shape_cast %76 : vector<1x1x8x1xf32> to vector<8x1xf32>
    %78 = vector.shape_cast %0 : vector<8x1xf32> to vector<1x1x8x1xf32>
    tpu.vector_store %arg3[%c0_98, %c9_99, %c0_100, %c0_101], %78 {strides = array<i32>} : memref<1x12x8x16xf32, #tpu.memory_space<vmem>>, vector<1x1x8x1xf32>,
    %c0_102 = arith.constant 0 : index
    %c3_103 = arith.constant 3 : index
    %c0_104 = arith.constant 0 : index
    %c0_105 = arith.constant 0 : index
    %79 = vector.load %arg2[%c0_102, %c3_103, %c0_104, %c0_105] : memref<1x4x8x16xf32, #tpu.memory_space<vmem>>, vector<1x1x8x16xf32>
    %80 = vector.shape_cast %79 : vector<1x1x8x16xf32> to vector<8x16xf32>
    %c0_106 = arith.constant 0 : index
    %c10 = arith.constant 10 : index
    %c0_107 = arith.constant 0 : index
    %c0_108 = arith.constant 0 : index
    %81 = vector.load %arg3[%c0_106, %c10, %c0_107, %c0_108] : memref<1x12x8x16xf32, #tpu.memory_space<vmem>>, vector<1x1x8x16xf32>
    %82 = vector.shape_cast %81 : vector<1x1x8x16xf32> to vector<8x16xf32>
    %83 = vector.shape_cast %80 : vector<8x16xf32> to vector<1x1x8x16xf32>
    tpu.vector_store %arg3[%c0_106, %c10, %c0_107, %c0_108], %83 {strides = array<i32>} : memref<1x12x8x16xf32, #tpu.memory_space<vmem>>, vector<1x1x8x16xf32>,
    %c0_109 = arith.constant 0 : index
    %c3_110 = arith.constant 3 : index
    %c0_111 = arith.constant 0 : index
    %c0_112 = arith.constant 0 : index
    %84 = vector.load %arg2[%c0_109, %c3_110, %c0_111, %c0_112] : memref<1x4x8x16xf32, #tpu.memory_space<vmem>>, vector<1x1x8x16xf32>
    %85 = vector.shape_cast %84 : vector<1x1x8x16xf32> to vector<8x16xf32>
    %c15_i32_113 = arith.constant 15 : i32
    %86 = tpu.dynamic_rotate %85 by %c15_i32_113 dim 1 : vector<8x16xf32>, i32 -> vector<8x16xf32>
    %c0_114 = arith.constant 0 : index
    %c11 = arith.constant 11 : index
    %c0_115 = arith.constant 0 : index
    %c0_116 = arith.constant 0 : index
    %87 = vector.load %arg3[%c0_114, %c11, %c0_115, %c0_116] : memref<1x12x8x16xf32, #tpu.memory_space<vmem>>, vector<1x1x8x16xf32>
    %88 = vector.shape_cast %87 : vector<1x1x8x16xf32> to vector<8x16xf32>
    %89 = vector.shape_cast %86 : vector<8x16xf32> to vector<1x1x8x16xf32>
    tpu.vector_store %arg3[%c0_114, %c11, %c0_115, %c0_116], %89 {strides = array<i32>} : memref<1x12x8x16xf32, #tpu.memory_space<vmem>>, vector<1x1x8x16xf32>,
    %c0_117 = arith.constant 0 : index
    %c11_118 = arith.constant 11 : index
    %c0_119 = arith.constant 0 : index
    %c15_120 = arith.constant 15 : index
    %90 = vector.load %arg3[%c0_117, %c11_118, %c0_119, %c15_120] : memref<1x12x8x16xf32, #tpu.memory_space<vmem>>, vector<1x1x8x1xf32>
    %91 = vector.shape_cast %90 : vector<1x1x8x1xf32> to vector<8x1xf32>
    %92 = vector.shape_cast %0 : vector<8x1xf32> to vector<1x1x8x1xf32>
    tpu.vector_store %arg3[%c0_117, %c11_118, %c0_119, %c15_120], %92 {strides = array<i32>} : memref<1x12x8x16xf32, #tpu.memory_space<vmem>>, vector<1x1x8x1xf32>,
    return
  }
  func.func @transform_0(%arg0: i32, %arg1: i32) -> (i32, i32, i32, i32) {
    %c0_i32 = arith.constant 0 : i32
    %c0_i32_0 = arith.constant 0 : i32
    %c0_i32_1 = arith.constant 0 : i32
    return %arg0, %c0_i32, %arg1, %c0_i32_0 : i32, i32, i32, i32
  }
  func.func @transform_1(%arg0: i32, %arg1: i32) -> (i32, i32, i32, i32) {
    %c0_i32 = arith.constant 0 : i32
    %c0_i32_0 = arith.constant 0 : i32
    %c0_i32_1 = arith.constant 0 : i32
    return %arg0, %c0_i32, %arg1, %c0_i32_0 : i32, i32, i32, i32
  }
}

</mosaic_0001>

<bundles_post_ra>
// kernel: tpu_custom_call.1
= control target key start
LH: loop header
LB: loop body
LE: loop exit
PB: predicated region body
PF: predicated region fallthrough
CT: control target
= control target key end

     0   :  { %6 = vsyncpa [#allocation3], 0  ;;  %s937_s0 = inlined_call_operand.hbm [shape: f32[2,4,16,16], index: 0, kind: input, shape index: {}]   ;;  %s938_s1 = inlined_call_operand.hbm [shape: f32[2,12,16,16], index: 1, kind: output, shape index: {}]  }
   0x1   :  { %8 = vsyncpa [#allocation3 + $0x1], 0 }
   0x2   :  { %9 = vsyncpa [#allocation4], 0 }
   0x3   :  { %11 = vsyncpa [#allocation4 + $0x1], 0  ;;  %s666_s6 = smov 0   ;;  %s668_s7 = smov 0  }
   0x4   :  { %s670_s8 = smov 0   ;;  %s672_s9 = smov 0  }
   0x5   :  { %s674_s10 = smov 0   ;;  %s676_s11 = smov 0  }
   0x6   :  { %s678_s12 = smov 0   ;;  %s680_s13 = smov 0  }
   0x7 LB: > { %s385_s14 = sadd.s32 4294967295, %s642_s13   ;;  %s386_s15 = sadd.s32 4294967294, %s642_s13   ;;  %s642_s13 = sphi %s680_s13, %s17_s13   ;;  %s638_s12 = sphi %s678_s12, %s953_s12   ;;  %s634_s11 = sphi %s676_s11, %s952_s11   ;;  %s630_s10 = sphi %s674_s10, %s951_s10   ;;  %s626_s9 = sphi %s672_s9, %s950_s9   ;;  %s622_s8 = sphi %s670_s8, %s949_s8   ;;  %s618_s7 = sphi %s668_s7, %s948_s7   ;;  %s614_s6 = sphi %s666_s6, %s947_s6  }
   0x8   : > { %s26_s16 = sadd.s32 1, %s634_s11  ;;  %s29_s17 = sadd.s32 1, %s638_s12 }
   0x9   : > { %p27_p0 = scmp.ge.s32.totalorder %s26_s16, 2  ;;  %s38_s18 = sadd.s32 1, %s622_s8 }
   0xa   : > { %p45_p1 = scmp.ne.s32.totalorder %s622_s8, %s618_s7  ;;  %p46_p2 = scmp.eq.s32.totalorder %s642_s13, 0 }
   0xb   : > { %s955_s16 = smov (%p27_p0, %s26_s16), 0  ;;  %s957_s17 = smov (!%p27_p0, %s29_s17), %s638_s12 }
   0xc   : > { %s34_s19 = ssub.s32 %s634_s11, %s955_s16  ;;  %p719_p3 = por %p46_p2, %p45_p1 }
   0xd   : > { %p31_p4 = scmp.ge.s32.totalorder %s957_s17, 2  ;;  %p51_p5 = scmp.ne.s32.totalorder %s618_s7, %s614_s6 }
   0xe   : > { %p52_p6 = scmp.eq.s32.totalorder %s385_s14, 0  ;;  %p77_p7 = scmp.eq.s32.totalorder %s385_s14, 3 }
   0xf   : > { %s959_s17 = smov (%p31_p4, %s957_s17), 0  ;;  %p83_p10 = scmp.eq.s32.totalorder %s386_s15, 3 }
  0x10   : > { %p727_p8 = por %p52_p6, %p51_p5  ;;  %p731_p9 = por %p77_p7, %p45_p1 }
  0x11   : > { %s33_s23 = ssub.s32 %s638_s12, %s959_s17  ;;  %p737_p12 = por %p83_p10, %p51_p5 }
  0x12   : > { %s942_s22 = scalar_select %p731_p9, 1, 0 }
  0x13   : > { %s35_s24 = sor.u32 %s34_s19, %s33_s23  ;;  %p438_p13 = scmp.lt.s32.totalorder %s642_s13, 4 }
  0x14   : > { %p36_p11 = scmp.eq.s32.totalorder %s35_s24, 0  ;;  %s103_s26 = sand.u32 1, %s622_s8  }
  0x15   : > { %s943_s25 = scalar_select %p737_p12, 1, 0 }
  0x16   : > { %s744_s27 = scalar_select %p36_p11, %s622_s8, %s38_s18  }
  0x17   : > { %s389_s28 = sshll.u32 %s103_s26, 5  ;;  %s390_s29 = sshll.u32 %s638_s12, 3 }
  0x18   : > { %s112_s30 = sadd.s32 %s634_s11, %s390_s29  ;;  %s107_s2 = scalar_lea.vmem [#allocation2], %s389_s28 }
  0x19   : > { %s115_s3 = sshll.u32 %s107_s2, 4  ;;  %s391_s4 = sshll.u32 %s112_s30, 7  ;;  %s748_s3 = int_to_ptr.vmem [resolvable:$true] %s115_s3 }
  0x1a   : > { %s753_s15 = scalar_lea.hbm %s937_s0, %s391_s4  ;;  %p757_p0 = pnand %p438_p13, %p719_p3 }
  0x1b   : > { %s761_s19 = scalar_lea.sflag [#allocation3], %s103_s26  ;;  %s514_s23 = scalar_lea.hbm %s753_s15, 512 }
  0x1c   : > { %p515_p1 = scmp.ne.s32.totalorder %s753_s15, %s514_s23  ;;  %p516_p2 = pneg %p757_p0 }
  0x1d   : > { %s519_s28 = scalar_lea.hbm %s937_s0, 2048  ;;  %p520_p3 = scmp.lt.u32.totalorder %s753_s15, %s937_s0 }
  0x1e   : > { %p517_p4 = pnand %p516_p2, %p515_p1  ;;  %p521_p6 = scmp.lt.u32.totalorder %s519_s28, %s514_s23 }
  0x1f   : > { %p523_p10 = scmp.lt.u32.totalorder %s514_s23, %s753_s15 }
  0x20   : > { %p518_p5 = pneg %p517_p4  ;;  %p522_p7 = por %p521_p6, %p520_p3 }
  0x22   : > { %p524_p11 = por %p523_p10, %p522_p7 }
  0x24   : > { %p525_p13 = pnand %p524_p11, %p518_p5 }
  0x26   : > { %528 = shalt.err (!%p525_p13)
}
  0x27   : > { %s529_s26 = scalar_lea.vmem %s748_s3, 512  ;;  %s644_s2 = smov [#allocation2]  }
  0x28   : > { %p530_p1 = scmp.ne.s32.totalorder %s748_s3, %s529_s26  ;;  %s534_s4 = sshll.u32 %s644_s2, 4  ;;  %s535_s4 = int_to_ptr.vmem [resolvable:$false] %s534_s4 }
  0x29   : > { %s536_s5 = scalar_lea.vmem %s535_s4, 1024  ;;  %p537_p9 = scmp.lt.s32.totalorder %s748_s3, %s535_s4 }
  0x2a   : > { %p532_p4 = pnand %p530_p1, %p516_p2  ;;  %p538_p3 = scmp.lt.s32.totalorder %s536_s5, %s529_s26 }
  0x2c   : > { %p533_p12 = pneg %p532_p4  ;;  %p539_p6 = por %p538_p3, %p537_p9 }
  0x2e   : > { %p540_p7 = pnand %p539_p6, %p533_p12 }
  0x30   : > { %543 = shalt.err (!%p540_p7)
}
  0x31   : > { %s645_s14 = smov 256   ;;  %s646_s23 = smov 128  }
  0x32   : > { %s647_s20 = smov 8   ;;  %p392_p2 = scmp.ge.s32.totalorder %s642_s13, 1 }
  0x33   : > { %433 = dma.hbm_to_vmem [thread:$0]  (!%p757_p0), %s753_s15, 512, %s748_s3, %s761_s19, %s645_s14, %s646_s23, %s647_s20  }
  0x34   : > { %p123_p5 = scmp.lt.s32.totalorder %s642_s13, 5 }
  0x36   : > { %p124_p10 = pnand %p392_p2, %p123_p5 }
  0x37   : > { %s792_s24 = sand.u32 (!%p124_p10), 1, %s618_s7  }
  0x38   : > { %127 = sbr.rel (%p124_p10) target bundleno = 445 (0x1bd), region = 24  ;;  %s393_s28 = sshll.u32 (!%p124_p10), %s792_s24, 5 }
  0x39   : > { %s130_s29 = scalar_lea.sflag (!%p124_p10), [#allocation3], %s792_s24  ;;  %s133_s30 = scalar_lea.vmem (!%p124_p10), [#allocation2], %s393_s28 }
  0x3f   : > { %605 = dma.done.wait (%p727_p8), %s130_s29, 512  }
  0x40   : > { %607 = vsyncadd (%p727_p8), %s130_s29, 4294966784  ;;  %v152_v0 = vld [vmem:[%s133_s30] sm:$0xff]  ;;  %v397_v1 = vld [vmem:[%s133_s30 + $0x8] sm:$0xff]  ;;  %s648_s3 = smov 16   ;;  %vm153_vm0 = vcmask 1047680   ;;  %s424_s21 = smul.u32 96, %s792_s24 }
  0x41   : > { %154 = vrot.lane.b32.xlu0 %v152_v0, %s648_s3  ;;  %188 = vrot.lane.b32.xlu1 %v397_v1, %s648_s3  ;;  %v410_v2 = vld [vmem:[%s133_s30 + $0x10] sm:$0xff]  ;;  %v418_v3 = vld [vmem:[%s133_s30 + $0x18] sm:$0xff]  ;;  %vm164_vm1 = vcmask 130048   ;;  %s649_s18 = smov 113   ;;  %s650_s19 = smov 127   ;;  %vm166_vm2 = vcmask 7168  }
  0x42   : > { %s817_s15 = scalar_lea.vmem [#allocation5], %s424_s21  ;;  %v651_v37 = vmov 0.0   ;;  %vm184_vm3 = vcmask 130168   ;;  %s425_s26 = smul.u32 24, %s630_s10 }
  0x43   : > { %394 = vst.msk [vmem:[%s817_s15 + $0x8] sm:$0xff] %vm164_vm1, %v152_v0  ;;  %401 = vst.msk [vmem:[%s817_s15 + $0x20] sm:$0xff] %vm164_vm1, %v397_v1  ;;  %s297_s4 = sshll.u32 %s817_s15, 4  ;;  %s283_s23 = scalar_lea.sflag [#allocation4], %s792_s24  ;;  %s879_s4 = int_to_ptr.vmem [resolvable:$true] %s297_s4 }
  0x44   : > { %409 = vst.msk [vmem:[%s817_s15 + $0x38] sm:$0xff] %vm164_vm1, %v410_v2  ;;  %417 = vst.msk [vmem:[%s817_s15 + $0x50] sm:$0xff] %vm164_vm1, %v418_v3  ;;  %s294_s2 = sadd.s32 %s626_s9, %s425_s26  ;;  %s544_s20 = scalar_lea.vmem %s879_s4, 1536 }
  0x45   : > { %172 = vrot.lane.b32.xlu0 %v152_v0, %s648_s3  ;;  %205 = vrot.lane.b32.xlu1 %v397_v1, %s648_s3  ;;  %s421_s10 = sshll.u32 %s294_s2, 7  ;;  %p545_p8 = scmp.ne.s32.totalorder %s879_s4, %s544_s20 }
  0x46   : > { %s877_s14 = scalar_lea.hbm %s938_s1, %s421_s10  ;;  %p945_p9 = scmp.ne.s32.totalorder %s942_s22, 0 }
  0x47   : > { %s652_s28 = smov [#allocation5]  }
  0x48   : > { %p546_p12 = pnand %p545_p8, %p945_p9  ;;  %s548_s29 = sshll.u32 %s652_s28, 4  ;;  %s549_s29 = int_to_ptr.vmem [resolvable:$false] %s548_s29 }
  0x49   : > { %237 = vrot.lane.b32.xlu1 %v410_v2, %s648_s3  ;;  %220 = vrot.lane.b32.xlu0 %v410_v2, %s648_s3  ;;  %s550_s30 = scalar_lea.vmem %s549_s29, 3072  ;;  %p551_p11 = scmp.lt.s32.totalorder %s879_s4, %s549_s29 }
  0x4a   : > { %p547_p0 = pneg %p546_p12  ;;  %p552_p13 = scmp.lt.s32.totalorder %s550_s30, %s544_s20 }
  0x4c   : > { %p553_p1 = por %p552_p13, %p551_p11 }
  0x4d   : > { %269 = vrot.lane.b32.xlu1 %v418_v3, %s648_s3  ;;  %252 = vrot.lane.b32.xlu0 %v418_v3, %s648_s3 }
  0x4e   : > { %p554_p4 = pnand %p553_p1, %p547_p0 }
  0xb3   : > { %v155_v4 = vpop.permute.xlu0 %154  ;;  %v189_v5 = vpop.permute.xlu1 %188 }
  0xb4   : > { %v156_v6 = vsel %vm153_vm0, %v155_v4, %v152_v0  ;;  %v190_v7 = vsel %vm153_vm0, %v189_v5, %v397_v1 }
  0xb5   : > { %157 = vrot.lane.b32.xlu0 %v156_v6, %s648_s3 }
  0xb7   : > { %v173_v8 = vpop.permute.xlu0 %172  ;;  %v206_v9 = vpop.permute.xlu1 %205 }
  0xb8   : > { %v174_v10 = vsel %vm153_vm0, %v173_v8, %v152_v0  ;;  %v207_v11 = vsel %vm153_vm0, %v206_v9, %v397_v1 }
  0xb9   : > { %191 = vrot.lane.b32.xlu0 %v190_v7, %s648_s3  ;;  %175 = vrot.lane.b32.xlu1 %v174_v10, %s648_s3 }
  0xbb   : > { %v238_v12 = vpop.permute.xlu1 %237  ;;  %v221_v13 = vpop.permute.xlu0 %220 }
  0xbc   : > { %v222_v14 = vsel %vm153_vm0, %v221_v13, %v410_v2  ;;  %v239_v15 = vsel %vm153_vm0, %v238_v12, %v410_v2 }
  0xbd   : > { %208 = vrot.lane.b32.xlu1 %v207_v11, %s648_s3  ;;  %223 = vrot.lane.b32.xlu0 %v222_v14, %s648_s3 }
  0xbf   : > { %v270_v16 = vpop.permute.xlu1 %269  ;;  %v253_v17 = vpop.permute.xlu0 %252 }
  0xc0   : > { %v254_v18 = vsel %vm153_vm0, %v253_v17, %v418_v3  ;;  %v271_v19 = vsel %vm153_vm0, %v270_v16, %v418_v3 }
  0xc1   : > { %240 = vrot.lane.b32.xlu1 %v239_v15, %s648_s3  ;;  %255 = vrot.lane.b32.xlu0 %v254_v18, %s648_s3 }
  0xc5   : > { %272 = vrot.lane.b32.xlu1 %v271_v19, %s648_s3 }
 0x127   : > { %v158_v20 = vpop.permute.xlu0 %157 }
 0x128   : > { %v159_v21 = vsel %vm153_vm0, %v158_v20, %v152_v0 }
 0x129   : > { %161 = vrot.lane.b32.xlu0 %v159_v21, %s649_s18 }
 0x12b   : > { %v176_v22 = vpop.permute.xlu1 %175  ;;  %v192_v23 = vpop.permute.xlu0 %191 }
 0x12c   : > { %v177_v24 = vsel %vm153_vm0, %v176_v22, %v152_v0  ;;  %v193_v25 = vsel %vm153_vm0, %v192_v23, %v397_v1 }
 0x12d   : > { %179 = vrot.lane.b32.xlu1 %v177_v24, %s650_s19  ;;  %195 = vrot.lane.b32.xlu0 %v193_v25, %s649_s18 }
 0x12f   : > { %v209_v26 = vpop.permute.xlu1 %208  ;;  %v224_v27 = vpop.permute.xlu0 %223 }
 0x130   : > { %v210_v28 = vsel %vm153_vm0, %v209_v26, %v397_v1  ;;  %v225_v29 = vsel %vm153_vm0, %v224_v27, %v410_v2 }
 0x131   : > { %212 = vrot.lane.b32.xlu1 %v210_v28, %s650_s19  ;;  %227 = vrot.lane.b32.xlu0 %v225_v29, %s649_s18 }
 0x133   : > { %v241_v30 = vpop.permute.xlu1 %240  ;;  %v256_v31 = vpop.permute.xlu0 %255 }
 0x134   : > { %v242_v32 = vsel %vm153_vm0, %v241_v30, %v410_v2  ;;  %v257_v33 = vsel %vm153_vm0, %v256_v31, %v418_v3 }
 0x135   : > { %244 = vrot.lane.b32.xlu1 %v242_v32, %s650_s19  ;;  %259 = vrot.lane.b32.xlu0 %v257_v33, %s649_s18 }
 0x137   : > { %v273_v34 = vpop.permute.xlu1 %272 }
 0x138   : > { %v274_v35 = vsel %vm153_vm0, %v273_v34, %v418_v3 }
 0x139   : > { %276 = vrot.lane.b32.xlu1 %v274_v35, %s650_s19 }
 0x19b   : > { %v162_v36 = vpop.permute.xlu0 %161 }
 0x19c   : > { %165 = vst.msk [vmem:[%s817_s15] sm:$0xff] %vm164_vm1, %v162_v36 }
 0x19d   : > { %167 = vst.msk [vmem:[%s817_s15] sm:$0xff] %vm166_vm2, %v651_v37 }
 0x19f   : > { %v180_v38 = vpop.permute.xlu1 %179  ;;  %v196_v39 = vpop.permute.xlu0 %195 }
 0x1a0   : > { %395 = vst.msk [vmem:[%s817_s15 + $0x10] sm:$0xff] %vm164_vm1, %v180_v38  ;;  %398 = vst.msk [vmem:[%s817_s15 + $0x18] sm:$0xff] %vm164_vm1, %v196_v39 }
 0x1a1   : > { %396 = vst.msk [vmem:[%s817_s15 + $0x10] sm:$0xff] %vm184_vm3, %v651_v37 }
 0x1a2   : > { %399 = vst.msk [vmem:[%s817_s15 + $0x18] sm:$0xff] %vm166_vm2, %v651_v37 }
 0x1a3   : > { %v213_v40 = vpop.permute.xlu1 %212  ;;  %v228_v41 = vpop.permute.xlu0 %227 }
 0x1a4   : > { %403 = vst.msk [vmem:[%s817_s15 + $0x28] sm:$0xff] %vm164_vm1, %v213_v40  ;;  %406 = vst.msk [vmem:[%s817_s15 + $0x30] sm:$0xff] %vm164_vm1, %v228_v41 }
 0x1a5   : > { %404 = vst.msk [vmem:[%s817_s15 + $0x28] sm:$0xff] %vm184_vm3, %v651_v37 }
 0x1a6   : > { %407 = vst.msk [vmem:[%s817_s15 + $0x30] sm:$0xff] %vm166_vm2, %v651_v37 }
 0x1a7   : > { %v245_v42 = vpop.permute.xlu1 %244  ;;  %v260_v43 = vpop.permute.xlu0 %259 }
 0x1a8   : > { %411 = vst.msk [vmem:[%s817_s15 + $0x40] sm:$0xff] %vm164_vm1, %v245_v42  ;;  %414 = vst.msk [vmem:[%s817_s15 + $0x48] sm:$0xff] %vm164_vm1, %v260_v43 }
 0x1a9   : > { %412 = vst.msk [vmem:[%s817_s15 + $0x40] sm:$0xff] %vm184_vm3, %v651_v37 }
 0x1aa   : > { %415 = vst.msk [vmem:[%s817_s15 + $0x48] sm:$0xff] %vm166_vm2, %v651_v37 }
 0x1ab   : > { %v277_v44 = vpop.permute.xlu1 %276 }
 0x1ac   : > { %419 = vst.msk [vmem:[%s817_s15 + $0x58] sm:$0xff] %vm164_vm1, %v277_v44 }
 0x1ad   : > { %420 = vst.msk [vmem:[%s817_s15 + $0x58] sm:$0xff] %vm184_vm3, %v651_v37 }
 0x1ae   : > { %557 = shalt.err (!%p554_p4)
}
 0x1af   : > { %s558_s3 = scalar_lea.hbm %s877_s14, 1536  ;;  %s562_s18 = scalar_lea.hbm %s938_s1, 6144 }
 0x1b0   : > { %p559_p3 = scmp.ne.s32.totalorder %s877_s14, %s558_s3  ;;  %p563_p2 = scmp.lt.u32.totalorder %s877_s14, %s938_s1 }
 0x1b1   : > { %p564_p5 = scmp.lt.u32.totalorder %s562_s18, %s558_s3  ;;  %p566_p8 = scmp.lt.u32.totalorder %s558_s3, %s877_s14 }
 0x1b2   : > { %p560_p6 = pnand %p559_p3, %p945_p9 }
 0x1b3   : > { %p565_p10 = por %p564_p5, %p563_p2 }
 0x1b4   : > { %p561_p7 = pneg %p560_p6 }
 0x1b5   : > { %p567_p12 = por %p566_p8, %p565_p10 }
 0x1b7   : > { %p568_p0 = pnand %p567_p12, %p561_p7 }
 0x1b9   : > { %571 = shalt.err (!%p568_p0)
}
 0x1ba   : > { %s653_s2 = smov 128   ;;  %s654_s10 = smov 256  }
 0x1bb   : > { %s655_s9 = smov 8  }
 0x1bc   : > { %428 = dma.vmem_to_hbm [thread:$0]  (%p945_p9), %s879_s4, 1536, %s877_s14, %s283_s23, %s653_s2, %s654_s10, %s655_s9  }
 0x1bd PF: > { %p439_p11 = scmp.ge.s32.totalorder %s642_s13, 2  ;;  %s312_s5 = sand.u32 1, %s614_s6  }
 0x1be   : > { %p946_p13 = scmp.ne.s32.totalorder %s943_s25, 0  ;;  %s313_s20 = scalar_lea.sflag [#allocation4], %s312_s5 }
 0x1c0   : > { %p435_p1 = pnand %p439_p11, %p946_p13 }
 0x1c2   : > { %609 = dma.done.wait (!%p435_p1), %s313_s20, 1536  }
 0x1c3   : > { %611 = vsyncadd (!%p435_p1), %s313_s20, 4294965760  ;;  %s17_s13 = sadd.s32 1, %s642_s13   ;;  %s947_s6 = smov %s618_s7 }
 0x1c4   : > { %p14_p4 = scmp.ge.s32.totalorder %s17_s13, 6   ;;  %s948_s7 = smov %s622_s8 }
 0x1c5   : > { %s949_s8 = smov %s744_s27  ;;  %s950_s9 = smov %s634_s11 }
 0x1c6   : > { %s951_s10 = smov %s638_s12  ;;  %s952_s11 = smov %s955_s16 }
 0x1c7   : > { %s953_s12 = smov %s959_s17  ;;  %16 = sbr.rel (!%p14_p4) target bundleno = 7 (0x7), region = 83 }
 0x1ce   :  { %318 = vsyncpa [#allocation3], 1 }
 0x1cf   :  { %320 = vsyncpa [#allocation3 + $0x1], 1 }
 0x1d0   :  { %321 = vsyncpa [#allocation4], 1 }
 0x1d1   :  { %323 = vsyncpa [#allocation4 + $0x1], 1 }

</bundles_post_ra>
